<compile_context>
chip_gen: v7x
topology: tpu7x:2x2x1
jax: 0.10.0
libtpu: 0.0.40
codegen_flags: <defaults>
</compile_context>

<pallas_src>
import functools

import jax
import jax.numpy as jnp
from jax import lax
from jax.experimental import pallas as pl
from jax.experimental.pallas import tpu as pltpu

BN_EPS = 1e-5
LEAKY_SLOPE = 0.01           # torch.nn.LeakyReLU default negative_slope
_LANES = 128
_VMEM_LIMIT_BYTES = 32 * 1024 * 1024   # explicit scoped-VMEM budget (safe on v5e/v6e/v7x)


def _round_up(n, m):
    return (n + m - 1) // m * m


# --------------------------------------------------------------------------------------
# Phase 1: global BatchNorm statistics (sum and sum-of-squares of h0 = x @ W1^T).
# --------------------------------------------------------------------------------------
def _stats_kernel(x_ref, w1_ref, sum_ref, ssq_ref, *, compute_dtype):
    """x_ref:(tile_B,D)  w1_ref:(H,D)  sum_ref/ssq_ref:(H,1) resident accumulators."""

    @pl.when(pl.program_id(0) == 0)
    def _init():
        sum_ref[...] = jnp.zeros_like(sum_ref)
        ssq_ref[...] = jnp.zeros_like(ssq_ref)

    x = x_ref[...].astype(compute_dtype)
    w1 = w1_ref[...].astype(compute_dtype)
    # (H,D) x (tile_B,D) contracting the last dims -> (H, tile_B): batch on lanes,
    # same battle-tested contraction pattern as q @ k^T in attention kernels.
    h = lax.dot_general(w1, x, (((1,), (1,)), ((), ())),
                        preferred_element_type=jnp.float32)
    sum_ref[...] += jnp.sum(h, axis=1, keepdims=True)
    ssq_ref[...] += jnp.sum(h * h, axis=1, keepdims=True)


# --------------------------------------------------------------------------------------
# Phase 2: normalize (folded affine) + LeakyReLU + fc3, lane-dense output.
# --------------------------------------------------------------------------------------
def _fwd_kernel(x_ref, w1_ref, scale_ref, offset_ref, w3_ref, b3_ref, o_ref, *,
                compute_dtype):
    """x_ref:(tile_B,D)  w1_ref:(H,D)  scale/offset/w3:(H,1)  b3:SMEM(1,)  o:(1,1,tile_B)."""
    x = x_ref[...].astype(compute_dtype)
    w1 = w1_ref[...].astype(compute_dtype)
    h = lax.dot_general(w1, x, (((1,), (1,)), ((), ())),
                        preferred_element_type=jnp.float32)        # (H, tile_B)

    # BatchNorm folded into a single per-feature scale/offset (fc1 bias cancels).
    hn = h * scale_ref[...] + offset_ref[...]
    a = jnp.where(hn >= 0, hn, LEAKY_SLOPE * hn)                   # LeakyReLU

    # fc3 (H -> 1) as VPU multiply + sublane reduce: avoids a K=32,N=1 MXU pass and
    # yields a natively lane-dense (1, tile_B) result for an unmasked store.
    res = jnp.sum(a * w3_ref[...], axis=0, keepdims=True) + b3_ref[0]
    o_ref[0] = res


# --------------------------------------------------------------------------------------
# Wrapper
# --------------------------------------------------------------------------------------
@functools.partial(jax.jit, static_argnames=("compute_dtype", "max_tile_b"))
def neural_network_forward(x, w1, b1, gamma, beta, w3, b3, *,
                           compute_dtype=jnp.float32, max_tile_b=2048):
    """Forward pass of the PyTorch module (training-mode BatchNorm1d).

    Shapes (PyTorch layout): x (B, D); w1 (H, D); b1 (H,); gamma/beta (H,);
    w3 (1, H); b3 (1,).  Returns (B, 1) float32.
    """
    del b1  # exactly cancelled by the BatchNorm mean subtraction (see header note)
    B, D = x.shape
    H = w1.shape[0]

    # Lane-aligned batch tile; large tiles amortize per-step overhead but stay tiny
    # vs. the scoped VMEM limit (2048x16 f32 x-tile = 128 KiB, double-buffered).
    tile_b = min(max_tile_b, _round_up(max(B, 1), _LANES))
    b_pad = _round_up(B, tile_b)
    n_tiles = b_pad // tile_b
    x_pad = x if b_pad == B else jnp.pad(x, ((0, b_pad - B), (0, 0)))

    resident = lambda i: (0, 0)   # constant block index -> param stays in VMEM

    # ---- phase 1: global sum / sum-of-squares over the (padded) batch ----
    sums, ssqs = pl.pallas_call(
        functools.partial(_stats_kernel, compute_dtype=compute_dtype),
        grid=(n_tiles,),
        in_specs=[
            pl.BlockSpec((tile_b, D), lambda i: (i, 0)),
            pl.BlockSpec((H, D), resident),
        ],
        out_specs=[
            pl.BlockSpec((H, 1), resident),
            pl.BlockSpec((H, 1), resident),
        ],
        out_shape=[
            jax.ShapeDtypeStruct((H, 1), jnp.float32),
            jax.ShapeDtypeStruct((H, 1), jnp.float32),
        ],
        compiler_params=pltpu.CompilerParams(
            dimension_semantics=("arbitrary",),
            vmem_limit_bytes=_VMEM_LIMIT_BYTES),
    )(x_pad, w1)

    # Fold BN (batch mean, biased batch variance, eps, affine) into scale/offset.
    mean0 = sums / B
    var = jnp.maximum(ssqs / B - mean0 * mean0, 0.0)
    inv_std = lax.rsqrt(var + BN_EPS)
    scale = gamma.reshape(H, 1).astype(jnp.float32) * inv_std
    offset = beta.reshape(H, 1).astype(jnp.float32) - mean0 * scale
    w3_col = w3.reshape(H, 1).astype(jnp.float32)
    b3_s = b3.reshape(1).astype(jnp.float32)

    # ---- phase 2: normalize + LeakyReLU + fc3 per batch tile (parallel) ----
    out_t = pl.pallas_call(
        functools.partial(_fwd_kernel, compute_dtype=compute_dtype),
        grid=(n_tiles,),
        in_specs=[
            pl.BlockSpec((tile_b, D), lambda i: (i, 0)),
            pl.BlockSpec((H, D), resident),
            pl.BlockSpec((H, 1), resident),
            pl.BlockSpec((H, 1), resident),
            pl.BlockSpec((H, 1), resident),
            pl.BlockSpec(memory_space=pltpu.MemorySpace.SMEM),
        ],
        out_specs=pl.BlockSpec((1, 1, tile_b), lambda i: (i, 0, 0)),
        out_shape=jax.ShapeDtypeStruct((n_tiles, 1, tile_b), jnp.float32),
        compiler_params=pltpu.CompilerParams(
            dimension_semantics=("parallel",),
            vmem_limit_bytes=_VMEM_LIMIT_BYTES),
    )(x_pad, w1, scale, offset, w3_col, b3_s)

    # Lane-dense (n_tiles, 1, tile_B) slab -> (B, 1); padded rows sliced off.
    return out_t.reshape(-1)[:B].reshape(B, 1)


# --------------------------------------------------------------------------------------
# Parameter init (mirrors the PyTorch module's __init__) and pure-JAX reference.
# --------------------------------------------------------------------------------------
def init_params(key, input_size, hidden_size):
    k1, k2, k3, k4 = jax.random.split(key, 4)
    limit1 = float(jnp.sqrt(6.0 / (input_size + hidden_size)))        # xavier_uniform_
    w1 = jax.random.uniform(k1, (hidden_size, input_size), jnp.float32, -limit1, limit1)
    b1_bound = 1.0 / float(jnp.sqrt(input_size))
    b1 = jax.random.uniform(k2, (hidden_size,), jnp.float32, -b1_bound, b1_bound)
    gamma = jnp.ones((hidden_size,), jnp.float32)                     # bn1.weight
    beta = jnp.zeros((hidden_size,), jnp.float32)                     # bn1.bias
    b3_bound = 1.0 / float(jnp.sqrt(hidden_size))                     # default Linear init
    w3 = jax.random.uniform(k3, (1, hidden_size), jnp.float32, -b3_bound, b3_bound)
    b3 = jax.random.uniform(k4, (1,), jnp.float32, -b3_bound, b3_bound)
    return w1, b1, gamma, beta, w3, b3


def reference_forward(x, w1, b1, gamma, beta, w3, b3):
    h = x @ w1.T + b1
    mean = jnp.mean(h, axis=0, keepdims=True)
    var = jnp.mean((h - mean) ** 2, axis=0, keepdims=True)
    hn = (h - mean) * lax.rsqrt(var + BN_EPS) * gamma + beta
    a = jnp.where(hn >= 0, hn, LEAKY_SLOPE * hn)
    # fc3 expanded as an explicit f32 sum-product (identical math to Linear(H->1)) so the
    # check is not sensitive to XLA's default matmul precision for the tiny final dot.
    return jnp.sum(a * w3.reshape(1, -1), axis=-1, keepdims=True) + b3


if __name__ == "__main__":
    input_size, hidden_size = 16, 32

    key = jax.random.PRNGKey(0)
    kx1, kx2, kp = jax.random.split(key, 3)
    params = init_params(kp, input_size, hidden_size)

    # Small case (single lane-aligned tile after zero padding 8 -> 128 rows).
    x_small = jax.random.normal(kx1, (8, input_size), jnp.float32)
    out_small = jax.block_until_ready(neural_network_forward(x_small, *params))
    ref_small = reference_forward(x_small, *params)
    assert out_small.shape == (8, 1), out_small.shape
    assert jnp.allclose(out_small, ref_small, atol=1e-3, rtol=1e-3), (out_small, ref_small)

    # Ragged multi-tile case: exercises zero padding, the global stats accumulator
    # across grid steps ("arbitrary") and the parallel normalize/fc3 grid.
    x_big = jax.random.normal(kx2, (300, input_size), jnp.float32)
    out_big = jax.block_until_ready(
        neural_network_forward(x_big, *params, max_tile_b=128))
    ref_big = reference_forward(x_big, *params)
    assert out_big.shape == (300, 1), out_big.shape
    assert jnp.allclose(out_big, ref_big, atol=1e-3, rtol=1e-3), (out_big, ref_big)

    print("KERNEL_OK")
</pallas_src>

<mosaic_0001>
module attributes {stable_mosaic.version = 11 : i64} {
  func.func @_stats_kernel(%arg0: i32, %arg1: memref<128x16xf32, #tpu.memory_space<vmem>>, %arg2: memref<32x16xf32, #tpu.memory_space<vmem>>, %arg3: memref<32x1xf32, #tpu.memory_space<vmem>>, %arg4: memref<32x1xf32, #tpu.memory_space<vmem>>) attributes {dimension_semantics = [#tpu.dimension_semantics<arbitrary>], iteration_bounds = array<i64: 1>, scalar_prefetch = 0 : i64, scratch_operands = 0 : i64, tpu.core_type = #tpu.core_type<tc>, window_params = [{transform_indices = @transform_0, window_bounds = array<i64: 128, 16>}, {pipeline_mode = #tpu.pipeline_mode<synchronous>, transform_indices = @transform_1, window_bounds = array<i64: 32, 16>}, {pipeline_mode = #tpu.pipeline_mode<synchronous>, transform_indices = @transform_2, window_bounds = array<i64: 32, 1>}, {pipeline_mode = #tpu.pipeline_mode<synchronous>, transform_indices = @transform_3, window_bounds = array<i64: 32, 1>}]} {
    %c0_i32 = arith.constant 0 : i32
    %0 = arith.cmpi eq, %arg0, %c0_i32 : i32
    %1 = arith.extui %0 : i1 to i32
    %c0_i32_0 = arith.constant 0 : i32
    %2 = arith.cmpi ne, %1, %c0_i32_0 : i32
    scf.if %2 {
      %cst_14 = arith.constant 0.000000e+00 : f32
      %17 = vector.broadcast %cst_14 : f32 to vector<32x1xf32>
      %c0_15 = arith.constant 0 : index
      %c0_16 = arith.constant 0 : index
      %18 = vector.load %arg3[%c0_15, %c0_16] : memref<32x1xf32, #tpu.memory_space<vmem>>, vector<32x1xf32>
      tpu.vector_store %arg3[%c0_15, %c0_16], %17 {strides = array<i32>} : memref<32x1xf32, #tpu.memory_space<vmem>>, vector<32x1xf32>,
      %cst_17 = arith.constant 0.000000e+00 : f32
      %19 = vector.broadcast %cst_17 : f32 to vector<32x1xf32>
      %c0_18 = arith.constant 0 : index
      %c0_19 = arith.constant 0 : index
      %20 = vector.load %arg4[%c0_18, %c0_19] : memref<32x1xf32, #tpu.memory_space<vmem>>, vector<32x1xf32>
      tpu.vector_store %arg4[%c0_18, %c0_19], %19 {strides = array<i32>} : memref<32x1xf32, #tpu.memory_space<vmem>>, vector<32x1xf32>,
    } else {
    }
    %c0 = arith.constant 0 : index
    %c0_1 = arith.constant 0 : index
    %3 = vector.load %arg1[%c0, %c0_1] : memref<128x16xf32, #tpu.memory_space<vmem>>, vector<128x16xf32>
    %c0_2 = arith.constant 0 : index
    %c0_3 = arith.constant 0 : index
    %4 = vector.load %arg2[%c0_2, %c0_3] : memref<32x16xf32, #tpu.memory_space<vmem>>, vector<32x16xf32>
    %cst = arith.constant dense<0.000000e+00> : vector<32x128xf32>
    %5 = tpu.matmul %4, %3, %cst {dimension_numbers = #tpu.dot_dimension_numbers<[1], [1], [0], [0], [0, 0, 1, 0], [], []>} : vector<32x16xf32>, vector<128x16xf32>, vector<32x128xf32> -> vector<32x128xf32>
    %c0_4 = arith.constant 0 : index
    %c0_5 = arith.constant 0 : index
    %6 = vector.load %arg3[%c0_4, %c0_5] : memref<32x1xf32, #tpu.memory_space<vmem>>, vector<32x1xf32>
    %cst_6 = arith.constant dense<0.000000e+00> : vector<32xf32>
    %7 = vector.multi_reduction <add>, %5, %cst_6 [1] : vector<32x128xf32> to vector<32xf32>
    %8 = vector.shape_cast %7 : vector<32xf32> to vector<32x1xf32>
    %9 = arith.addf %6, %8 : vector<32x1xf32>
    %c0_7 = arith.constant 0 : index
    %c0_8 = arith.constant 0 : index
    %10 = vector.load %arg3[%c0_7, %c0_8] : memref<32x1xf32, #tpu.memory_space<vmem>>, vector<32x1xf32>
    tpu.vector_store %arg3[%c0_7, %c0_8], %9 {strides = array<i32>} : memref<32x1xf32, #tpu.memory_space<vmem>>, vector<32x1xf32>,
    %c0_9 = arith.constant 0 : index
    %c0_10 = arith.constant 0 : index
    %11 = vector.load %arg4[%c0_9, %c0_10] : memref<32x1xf32, #tpu.memory_space<vmem>>, vector<32x1xf32>
    %12 = arith.mulf %5, %5 : vector<32x128xf32>
    %cst_11 = arith.constant dense<0.000000e+00> : vector<32xf32>
    %13 = vector.multi_reduction <add>, %12, %cst_11 [1] : vector<32x128xf32> to vector<32xf32>
    %14 = vector.shape_cast %13 : vector<32xf32> to vector<32x1xf32>
    %15 = arith.addf %11, %14 : vector<32x1xf32>
    %c0_12 = arith.constant 0 : index
    %c0_13 = arith.constant 0 : index
    %16 = vector.load %arg4[%c0_12, %c0_13] : memref<32x1xf32, #tpu.memory_space<vmem>>, vector<32x1xf32>
    tpu.vector_store %arg4[%c0_12, %c0_13], %15 {strides = array<i32>} : memref<32x1xf32, #tpu.memory_space<vmem>>, vector<32x1xf32>,
    return
  }
  func.func @transform_0(%arg0: i32) -> (i32, i32) {
    %c0_i32 = arith.constant 0 : i32
    %c0_i32_0 = arith.constant 0 : i32
    return %arg0, %c0_i32 : i32, i32
  }
  func.func @transform_1(%arg0: i32) -> (i32, i32) {
    %c0_i32 = arith.constant 0 : i32
    %c0_i32_0 = arith.constant 0 : i32
    %c0_i32_1 = arith.constant 0 : i32
    return %c0_i32, %c0_i32_0 : i32, i32
  }
  func.func @transform_2(%arg0: i32) -> (i32, i32) {
    %c0_i32 = arith.constant 0 : i32
    %c0_i32_0 = arith.constant 0 : i32
    %c0_i32_1 = arith.constant 0 : i32
    return %c0_i32, %c0_i32_0 : i32, i32
  }
  func.func @transform_3(%arg0: i32) -> (i32, i32) {
    %c0_i32 = arith.constant 0 : i32
    %c0_i32_0 = arith.constant 0 : i32
    %c0_i32_1 = arith.constant 0 : i32
    return %c0_i32, %c0_i32_0 : i32, i32
  }
}

module attributes {stable_mosaic.version = 11 : i64} {
  func.func @_fwd_kernel(%arg0: i32, %arg1: memref<128x16xf32, #tpu.memory_space<vmem>>, %arg2: memref<32x16xf32, #tpu.memory_space<vmem>>, %arg3: memref<32x1xf32, #tpu.memory_space<vmem>>, %arg4: memref<32x1xf32, #tpu.memory_space<vmem>>, %arg5: memref<32x1xf32, #tpu.memory_space<vmem>>, %arg6: memref<1xf32, #tpu.memory_space<smem>>, %arg7: memref<1x1x128xf32, #tpu.memory_space<vmem>>) attributes {dimension_semantics = [#tpu.dimension_semantics<parallel>], iteration_bounds = array<i64: 1>, scalar_prefetch = 0 : i64, scratch_operands = 0 : i64, tpu.core_type = #tpu.core_type<tc>, window_params = [{transform_indices = @transform_0, window_bounds = array<i64: 128, 16>}, {pipeline_mode = #tpu.pipeline_mode<synchronous>, transform_indices = @transform_1, window_bounds = array<i64: 32, 16>}, {pipeline_mode = #tpu.pipeline_mode<synchronous>, transform_indices = @transform_2, window_bounds = array<i64: 32, 1>}, {pipeline_mode = #tpu.pipeline_mode<synchronous>, transform_indices = @transform_3, window_bounds = array<i64: 32, 1>}, {pipeline_mode = #tpu.pipeline_mode<synchronous>, transform_indices = @transform_4, window_bounds = array<i64: 32, 1>}, {transform_indices = @transform_5, window_bounds = array<i64: 1>}, {transform_indices = @transform_6, window_bounds = array<i64: 1, 1, 128>}]} {
    %c0 = arith.constant 0 : index
    %c0_0 = arith.constant 0 : index
    %0 = vector.load %arg1[%c0, %c0_0] : memref<128x16xf32, #tpu.memory_space<vmem>>, vector<128x16xf32>
    %c0_1 = arith.constant 0 : index
    %c0_2 = arith.constant 0 : index
    %1 = vector.load %arg2[%c0_1, %c0_2] : memref<32x16xf32, #tpu.memory_space<vmem>>, vector<32x16xf32>
    %cst = arith.constant dense<0.000000e+00> : vector<32x128xf32>
    %2 = tpu.matmul %1, %0, %cst {dimension_numbers = #tpu.dot_dimension_numbers<[1], [1], [0], [0], [0, 0, 1, 0], [], []>} : vector<32x16xf32>, vector<128x16xf32>, vector<32x128xf32> -> vector<32x128xf32>
    %c0_3 = arith.constant 0 : index
    %c0_4 = arith.constant 0 : index
    %3 = vector.load %arg3[%c0_3, %c0_4] : memref<32x1xf32, #tpu.memory_space<vmem>>, vector<32x1xf32>
    %4 = vector.broadcast %3 : vector<32x1xf32> to vector<32x128xf32>
    %5 = arith.mulf %2, %4 : vector<32x128xf32>
    %c0_5 = arith.constant 0 : index
    %c0_6 = arith.constant 0 : index
    %6 = vector.load %arg4[%c0_5, %c0_6] : memref<32x1xf32, #tpu.memory_space<vmem>>, vector<32x1xf32>
    %7 = vector.broadcast %6 : vector<32x1xf32> to vector<32x128xf32>
    %8 = arith.addf %5, %7 : vector<32x128xf32>
    %cst_7 = arith.constant 0.000000e+00 : f32
    %9 = vector.broadcast %cst_7 : f32 to vector<32x128xf32>
    %10 = arith.cmpf oge, %8, %9 : vector<32x128xf32>
    %cst_8 = arith.constant 0.00999999977 : f32
    %11 = vector.broadcast %cst_8 : f32 to vector<32x128xf32>
    %12 = arith.mulf %11, %8 : vector<32x128xf32>
    %13 = arith.select %10, %8, %12 : vector<32x128xi1>, vector<32x128xf32>
    %c0_9 = arith.constant 0 : index
    %c0_10 = arith.constant 0 : index
    %14 = vector.load %arg5[%c0_9, %c0_10] : memref<32x1xf32, #tpu.memory_space<vmem>>, vector<32x1xf32>
    %15 = vector.broadcast %14 : vector<32x1xf32> to vector<32x128xf32>
    %16 = arith.mulf %13, %15 : vector<32x128xf32>
    %cst_11 = arith.constant dense<0.000000e+00> : vector<128xf32>
    %17 = vector.multi_reduction <add>, %16, %cst_11 [0] : vector<32x128xf32> to vector<128xf32>
    %18 = vector.shape_cast %17 : vector<128xf32> to vector<1x128xf32>
    %c0_12 = arith.constant 0 : index
    %19 = memref.load %arg6[%c0_12] : memref<1xf32, #tpu.memory_space<smem>>
    %20 = vector.broadcast %19 : f32 to vector<1x128xf32>
    %21 = arith.addf %18, %20 : vector<1x128xf32>
    %c0_13 = arith.constant 0 : index
    %c0_14 = arith.constant 0 : index
    %c0_15 = arith.constant 0 : index
    %22 = vector.load %arg7[%c0_13, %c0_14, %c0_15] : memref<1x1x128xf32, #tpu.memory_space<vmem>>, vector<1x1x128xf32>
    %23 = vector.shape_cast %22 : vector<1x1x128xf32> to vector<1x128xf32>
    %24 = vector.shape_cast %21 : vector<1x128xf32> to vector<1x1x128xf32>
    tpu.vector_store %arg7[%c0_13, %c0_14, %c0_15], %24 {strides = array<i32>} : memref<1x1x128xf32, #tpu.memory_space<vmem>>, vector<1x1x128xf32>,
    return
  }
  func.func @transform_0(%arg0: i32) -> (i32, i32) {
    %c0_i32 = arith.constant 0 : i32
    %c0_i32_0 = arith.constant 0 : i32
    return %arg0, %c0_i32 : i32, i32
  }
  func.func @transform_1(%arg0: i32) -> (i32, i32) {
    %c0_i32 = arith.constant 0 : i32
    %c0_i32_0 = arith.constant 0 : i32
    %c0_i32_1 = arith.constant 0 : i32
    return %c0_i32, %c0_i32_0 : i32, i32
  }
  func.func @transform_2(%arg0: i32) -> (i32, i32) {
    %c0_i32 = arith.constant 0 : i32
    %c0_i32_0 = arith.constant 0 : i32
    %c0_i32_1 = arith.constant 0 : i32
    return %c0_i32, %c0_i32_0 : i32, i32
  }
  func.func @transform_3(%arg0: i32) -> (i32, i32) {
    %c0_i32 = arith.constant 0 : i32
    %c0_i32_0 = arith.constant 0 : i32
    %c0_i32_1 = arith.constant 0 : i32
    return %c0_i32, %c0_i32_0 : i32, i32
  }
  func.func @transform_4(%arg0: i32) -> (i32, i32) {
    %c0_i32 = arith.constant 0 : i32
    %c0_i32_0 = arith.constant 0 : i32
    %c0_i32_1 = arith.constant 0 : i32
    return %c0_i32, %c0_i32_0 : i32, i32
  }
  func.func @transform_5(%arg0: i32) -> i32 {
    %c0_i32 = arith.constant 0 : i32
    %c0_i32_0 = arith.constant 0 : i32
    return %c0_i32 : i32
  }
  func.func @transform_6(%arg0: i32) -> (i32, i32, i32) {
    %c0_i32 = arith.constant 0 : i32
    %c0_i32_0 = arith.constant 0 : i32
    %c0_i32_1 = arith.constant 0 : i32
    return %arg0, %c0_i32, %c0_i32_0 : i32, i32, i32
  }
}

</mosaic_0001>

<bundles_post_ra>
// kernel: neural_network_forward.2
= control target key start
LH: loop header
LB: loop body
LE: loop exit
PB: predicated region body
PF: predicated region fallthrough
CT: control target
= control target key end

     0   :  { %vm46_vm0 = vcmask 130048   ;;  %vm17_vm2 = vcmask 7168   ;;  %v388_v29 = vmov 0.0   ;;  %s631_s0 = inlined_call_operand.vmem [shape: f32[128,16], index: 0, kind: input, shape index: {}]   ;;  %s632_s1 = inlined_call_operand.vmem [shape: f32[32,16], index: 1, kind: input, shape index: {}]   ;;  %s633_s2 = inlined_call_operand.vmem [shape: f32[32,1], index: 2, kind: output, shape index: {0}]   ;;  %s634_s3 = inlined_call_operand.vmem [shape: f32[32,1], index: 3, kind: output, shape index: {1}]  }
   0x1   :  { %v26_v0 = vld [vmem:[%s631_s0] sm:$0xff]  ;;  %v27_v1 = vld [vmem:[%s631_s0 + $0x8] sm:$0xff]  ;;  %vm417_vm1 = vmpackc.low %vm46_vm0, %vm46_vm0  ;;  %21 = vst.msk [vmem:[%s633_s2 + $0x18] sm:$0xff] %vm17_vm2, %v388_v29 }
   0x2   :  { %v323_v3 = vpack.c.bf16 %v27_v1, %v26_v0  ;;  %v28_v4 = vld [vmem:[%s631_s0 + $0x10] sm:$0xff]  ;;  %v29_v5 = vld [vmem:[%s631_s0 + $0x18] sm:$0xff]  ;;  %v42_v7 = vld [vmem:[%s632_s1] sm:$0xff]  ;;  %18 = vst.msk [vmem:[%s633_s2] sm:$0xff] %vm17_vm2, %v388_v29 }
   0x3   :  { %v329_v6 = vpack.c.bf16 %v29_v5, %v28_v4  ;;  %v30_v8 = vld [vmem:[%s631_s0 + $0x20] sm:$0xff]  ;;  %v31_v9 = vld [vmem:[%s631_s0 + $0x28] sm:$0xff]  ;;  %317 = vmatprep.mubr.msk.f32.mxu0 %vm46_vm0, %v42_v7  ;;  %v44_v10 = vld [vmem:[%s632_s1 + $0x10] sm:$0xff]  ;;  %19 = vst.msk [vmem:[%s633_s2 + $0x8] sm:$0xff] %vm17_vm2, %v388_v29 }
   0x4   :  { %325 = vmatprep.subr.msk.bf16.mxu0 %vm417_vm1, %v323_v3  ;;  %371 = vmatprep.subr.msk.bf16.mxu1 %vm417_vm1, %v323_v3  ;;  %v335_v11 = vpack.c.bf16 %v31_v9, %v30_v8  ;;  %v32_v12 = vld [vmem:[%s631_s0 + $0x30] sm:$0xff]  ;;  %v33_v13 = vld [vmem:[%s631_s0 + $0x38] sm:$0xff]  ;;  %v34_v15 = vld [vmem:[%s631_s0 + $0x40] sm:$0xff]  ;;  %20 = vst.msk [vmem:[%s633_s2 + $0x10] sm:$0xff] %vm17_vm2, %v388_v29 }
   0x5   :  { %328 = vmatpush3.bf16.xpose.msk.msra.mxu0 %vm417_vm1, %v323_v3  ;;  %379 = vmatpush3.bf16.xpose.msk.msra.mxu1 %vm417_vm1, %v323_v3  ;;  %v341_v14 = vpack.c.bf16 %v33_v13, %v32_v12  ;;  %v35_v16 = vld [vmem:[%s631_s0 + $0x48] sm:$0xff]  ;;  %v36_v18 = vld [vmem:[%s631_s0 + $0x50] sm:$0xff]  ;;  %v37_v19 = vld [vmem:[%s631_s0 + $0x58] sm:$0xff]  ;;  %23 = vst.msk [vmem:[%s634_s3 + $0x8] sm:$0xff] %vm17_vm2, %v388_v29 }
   0x6   :  { %331 = vmatprep.subr.msk.bf16.mxu0 %vm417_vm1, %v329_v6  ;;  %372 = vmatprep.subr.msk.bf16.mxu1 %vm417_vm1, %v329_v6  ;;  %v347_v17 = vpack.c.bf16 %v35_v16, %v34_v15  ;;  %v353_v20 = vpack.c.bf16 %v37_v19, %v36_v18  ;;  %v38_v21 = vld [vmem:[%s631_s0 + $0x60] sm:$0xff]  ;;  %v39_v22 = vld [vmem:[%s631_s0 + $0x68] sm:$0xff]  ;;  %v40_v24 = vld [vmem:[%s631_s0 + $0x70] sm:$0xff]  ;;  %22 = vst.msk [vmem:[%s634_s3] sm:$0xff] %vm17_vm2, %v388_v29 }
   0x7   :  { %320 = vmatprep.mubr.msk.f32.mxu1 %vm46_vm0, %v44_v10  ;;  %v359_v23 = vpack.c.bf16 %v39_v22, %v38_v21  ;;  %v41_v25 = vld [vmem:[%s631_s0 + $0x78] sm:$0xff]  ;;  %v43_v27 = vld [vmem:[%s632_s1 + $0x8] sm:$0xff]  ;;  %24 = vst.msk [vmem:[%s634_s3 + $0x10] sm:$0xff] %vm17_vm2, %v388_v29  ;;  %25 = vst.msk [vmem:[%s634_s3 + $0x18] sm:$0xff] %vm17_vm2, %v388_v29 }
   0x8   :  { %v365_v26 = vpack.c.bf16 %v41_v25, %v40_v24  ;;  %v45_v28 = vld [vmem:[%s632_s1 + $0x18] sm:$0xff] }
   0x9   :  { %v195_v38 = vld [vmem:[%s633_s2 + $0x18] sm:$0xff]  ;;  %v192_v45 = vld [vmem:[%s633_s2] sm:$0xff] }
   0xa   :  { %v193_v39 = vld [vmem:[%s633_s2 + $0x8] sm:$0xff] }
   0xb   :  { %v194_v44 = vld [vmem:[%s633_s2 + $0x10] sm:$0xff] }
   0xc   :  { %v214_v50 = vld [vmem:[%s634_s3 + $0x8] sm:$0xff] }
   0xd   :  { %334 = vmatpush3.bf16.xpose.msk.msra.mxu0 %vm417_vm1, %v329_v6  ;;  %380 = vmatpush3.bf16.xpose.msk.msra.mxu1 %vm417_vm1, %v329_v6  ;;  %v213_v51 = vld [vmem:[%s634_s3] sm:$0xff] }
   0xe   :  { %337 = vmatprep.subr.msk.bf16.mxu0 %vm417_vm1, %v335_v11  ;;  %373 = vmatprep.subr.msk.bf16.mxu1 %vm417_vm1, %v335_v11  ;;  %v216_v56 = vld [vmem:[%s634_s3 + $0x18] sm:$0xff]  ;;  %v215_v57 = vld [vmem:[%s634_s3 + $0x10] sm:$0xff] }
  0x15   :  { %340 = vmatpush3.bf16.xpose.msk.msra.mxu0 %vm417_vm1, %v335_v11  ;;  %381 = vmatpush3.bf16.xpose.msk.msra.mxu1 %vm417_vm1, %v335_v11 }
  0x16   :  { %343 = vmatprep.subr.msk.bf16.mxu0 %vm417_vm1, %v341_v14  ;;  %374 = vmatprep.subr.msk.bf16.mxu1 %vm417_vm1, %v341_v14 }
  0x1d   :  { %346 = vmatpush3.bf16.xpose.msk.msra.mxu0 %vm417_vm1, %v341_v14  ;;  %382 = vmatpush3.bf16.xpose.msk.msra.mxu1 %vm417_vm1, %v341_v14 }
  0x1e   :  { %349 = vmatprep.subr.msk.bf16.mxu0 %vm417_vm1, %v347_v17  ;;  %375 = vmatprep.subr.msk.bf16.mxu1 %vm417_vm1, %v347_v17 }
  0x25   :  { %352 = vmatpush3.bf16.xpose.msk.msra.mxu0 %vm417_vm1, %v347_v17  ;;  %383 = vmatpush3.bf16.xpose.msk.msra.mxu1 %vm417_vm1, %v347_v17 }
  0x26   :  { %355 = vmatprep.subr.msk.bf16.mxu0 %vm417_vm1, %v353_v20  ;;  %376 = vmatprep.subr.msk.bf16.mxu1 %vm417_vm1, %v353_v20 }
  0x2d   :  { %358 = vmatpush3.bf16.xpose.msk.msra.mxu0 %vm417_vm1, %v353_v20  ;;  %384 = vmatpush3.bf16.xpose.msk.msra.mxu1 %vm417_vm1, %v353_v20 }
  0x2e   :  { %361 = vmatprep.subr.msk.bf16.mxu0 %vm417_vm1, %v359_v23  ;;  %377 = vmatprep.subr.msk.bf16.mxu1 %vm417_vm1, %v359_v23 }
  0x35   :  { %364 = vmatpush3.bf16.xpose.msk.msra.mxu0 %vm417_vm1, %v359_v23  ;;  %385 = vmatpush3.bf16.xpose.msk.msra.mxu1 %vm417_vm1, %v359_v23 }
  0x36   :  { %367 = vmatprep.subr.msk.bf16.mxu0 %vm417_vm1, %v365_v26  ;;  %378 = vmatprep.subr.msk.bf16.mxu1 %vm417_vm1, %v365_v26 }
  0x3d   :  { %370 = vmatpush3.bf16.xpose.msk.msra.mxu0 %vm417_vm1, %v365_v26  ;;  %386 = vmatpush3.bf16.xpose.msk.msra.mxu1 %vm417_vm1, %v365_v26 }
  0x44   :  { %318 = vmatmul.mubr.msk.f32.vlgmr.msra.gmra.mrb[0].mxu0 %vm46_vm0, %v43_v27  ;;  %321 = vmatmul.mubr.msk.f32.vlgmr.msra.gmra.mrb[0].mxu1 %vm46_vm0, %v45_v28 }
 0x117   :  { %v319_v30 = vpop.f32.mrb[0].mxu0  ;;  %v322_v31 = vpop.f32.mrb[0].mxu1 }
 0x118   :  { %202 = vadd.xlane.f32.xlu1 %v322_v31  ;;  %v183_v32 = vpop.f32.mrb[1].mxu1  ;;  %198 = vadd.xlane.f32.xlu0 %v319_v30  ;;  %v173_v33 = vpop.f32.mrb[1].mxu0  ;;  %v218_v35 = vmul.f32 %v319_v30, %v319_v30  ;;  %v220_v37 = vmul.f32 %v322_v31, %v322_v31 }
 0x119   :  { %v217_v34 = vmul.f32 %v173_v33, %v173_v33  ;;  %v219_v36 = vmul.f32 %v183_v32, %v183_v32 }
 0x11c   :  { %200 = vadd.xlane.f32.xlu1 %v183_v32  ;;  %196 = vadd.xlane.f32.xlu0 %v173_v33 }
 0x120   :  { %223 = vadd.xlane.f32.xlu1 %v218_v35  ;;  %221 = vadd.xlane.f32.xlu0 %v217_v34 }
 0x124   :  { %227 = vadd.xlane.f32.xlu1 %v220_v37  ;;  %225 = vadd.xlane.f32.xlu0 %v219_v36 }
 0x1a5   :  { %v203_v40 = vpop.xlane.xlu1 %202  ;;  %v199_v41 = vpop.xlane.xlu0 %198 }
 0x1a6   :  { %v207_v42 = vadd.f32 %v203_v40, %v195_v38  ;;  %v205_v43 = vadd.f32 %v199_v41, %v193_v39 }
 0x1a8   :  { %212 = vst.msk [vmem:[%s633_s2 + $0x18] sm:$0xff] %vm17_vm2, %v207_v42  ;;  %210 = vst.msk [vmem:[%s633_s2 + $0x8] sm:$0xff] %vm17_vm2, %v205_v43 }
 0x1a9   :  { %v201_v46 = vpop.xlane.xlu1 %200  ;;  %v197_v47 = vpop.xlane.xlu0 %196 }
 0x1aa   :  { %v206_v48 = vadd.f32 %v201_v46, %v194_v44  ;;  %v204_v49 = vadd.f32 %v197_v47, %v192_v45 }
 0x1ac   :  { %211 = vst.msk [vmem:[%s633_s2 + $0x10] sm:$0xff] %vm17_vm2, %v206_v48  ;;  %209 = vst.msk [vmem:[%s633_s2] sm:$0xff] %vm17_vm2, %v204_v49 }
 0x1ad   :  { %v224_v52 = vpop.xlane.xlu1 %223  ;;  %v222_v53 = vpop.xlane.xlu0 %221 }
 0x1ae   :  { %v230_v54 = vadd.f32 %v224_v52, %v214_v50  ;;  %v229_v55 = vadd.f32 %v222_v53, %v213_v51 }
 0x1b0   :  { %234 = vst.msk [vmem:[%s634_s3 + $0x8] sm:$0xff] %vm17_vm2, %v230_v54  ;;  %233 = vst.msk [vmem:[%s634_s3] sm:$0xff] %vm17_vm2, %v229_v55 }
 0x1b1   :  { %v228_v58 = vpop.xlane.xlu1 %227  ;;  %v226_v59 = vpop.xlane.xlu0 %225 }
 0x1b2   :  { %v232_v60 = vadd.f32 %v228_v58, %v216_v56  ;;  %v231_v61 = vadd.f32 %v226_v59, %v215_v57 }
 0x1b4   :  { %236 = vst.msk [vmem:[%s634_s3 + $0x18] sm:$0xff] %vm17_vm2, %v232_v60  ;;  %235 = vst.msk [vmem:[%s634_s3 + $0x10] sm:$0xff] %vm17_vm2, %v231_v61 }

// kernel: neural_network_forward.3
= control target key start
LH: loop header
LB: loop body
LE: loop exit
PB: predicated region body
PF: predicated region fallthrough
CT: control target
= control target key end

     0   :  { %vm44_vm0 = vcmask 130048   ;;  %v448_v3 = vmov 0   ;;  %s660_s0 = inlined_call_operand.vmem [shape: f32[128,16], index: 0, kind: input, shape index: {}]   ;;  %s661_s1 = inlined_call_operand.vmem [shape: f32[32,16], index: 1, kind: input, shape index: {}]   ;;  %s662_s2 = inlined_call_operand.vmem [shape: f32[32,1], index: 2, kind: input, shape index: {}]   ;;  %s663_s3 = inlined_call_operand.vmem [shape: f32[32,1], index: 3, kind: input, shape index: {}]   ;;  %s664_s4 = inlined_call_operand.vmem [shape: f32[32,1], index: 4, kind: input, shape index: {}]   ;;  %s665_s5 = inlined_call_operand.<no memory space> [shape: f32[1], index: 5, kind: input, shape index: {}]   ;;  %s666_s6 = inlined_call_operand.vmem [shape: f32[1,1,128], index: 6, kind: output, shape index: {}]  }
   0x1   :  { %v24_v0 = vld [vmem:[%s660_s0] sm:$0xff]  ;;  %v25_v1 = vld [vmem:[%s660_s0 + $0x8] sm:$0xff]  ;;  %vm492_vm1 = vmpackc.low %vm44_vm0, %vm44_vm0  ;;  %446 = vset.pattern.permute.xlu0 %v448_v3  ;;  %447 = vset.pattern.permute.xlu1 %v448_v3 }
   0x2   :  { %v381_v4 = vpack.c.bf16 %v25_v1, %v24_v0  ;;  %v26_v5 = vld [vmem:[%s660_s0 + $0x10] sm:$0xff]  ;;  %v27_v6 = vld [vmem:[%s660_s0 + $0x18] sm:$0xff]  ;;  %v40_v8 = vld [vmem:[%s661_s1] sm:$0xff] }
   0x3   :  { %v387_v7 = vpack.c.bf16 %v27_v6, %v26_v5  ;;  %v28_v9 = vld [vmem:[%s660_s0 + $0x20] sm:$0xff]  ;;  %v29_v10 = vld [vmem:[%s660_s0 + $0x28] sm:$0xff]  ;;  %375 = vmatprep.mubr.msk.f32.mxu0 %vm44_vm0, %v40_v8  ;;  %v42_v11 = vld [vmem:[%s661_s1 + $0x10] sm:$0xff] }
   0x4   :  { %383 = vmatprep.subr.msk.bf16.mxu0 %vm492_vm1, %v381_v4  ;;  %429 = vmatprep.subr.msk.bf16.mxu1 %vm492_vm1, %v381_v4  ;;  %v190_v12 = vld [vmem:[%s662_s2] sm:$0xff]  ;;  %v192_v13 = vld [vmem:[%s662_s2 + $0x10] sm:$0xff]  ;;  %v393_v14 = vpack.c.bf16 %v29_v10, %v28_v9  ;;  %v191_v15 = vld [vmem:[%s662_s2 + $0x8] sm:$0xff] }
   0x5   :  { %386 = vmatpush3.bf16.xpose.msk.msra.mxu0 %vm492_vm1, %v381_v4  ;;  %437 = vmatpush3.bf16.xpose.msk.msra.mxu1 %vm492_vm1, %v381_v4  ;;  %v218_v16 = vld [vmem:[%s663_s3] sm:$0xff]  ;;  %v30_v17 = vld [vmem:[%s660_s0 + $0x30] sm:$0xff]  ;;  %v31_v18 = vld [vmem:[%s660_s0 + $0x38] sm:$0xff] }
   0x6   :  { %389 = vmatprep.subr.msk.bf16.mxu0 %vm492_vm1, %v387_v7  ;;  %430 = vmatprep.subr.msk.bf16.mxu1 %vm492_vm1, %v387_v7  ;;  %v219_v19 = vld [vmem:[%s663_s3 + $0x8] sm:$0xff]  ;;  %v193_v20 = vld [vmem:[%s662_s2 + $0x18] sm:$0xff]  ;;  %v399_v21 = vpack.c.bf16 %v31_v18, %v30_v17  ;;  %v220_v22 = vld [vmem:[%s663_s3 + $0x10] sm:$0xff] }
   0x7   :  { %378 = vmatprep.mubr.msk.f32.mxu1 %vm44_vm0, %v42_v11  ;;  %196 = vperm.xlu0 %446, %v190_v12   ;;  %v221_v23 = vld [vmem:[%s663_s3 + $0x18] sm:$0xff]  ;;  %v32_v24 = vld [vmem:[%s660_s0 + $0x40] sm:$0xff]  ;;  %v33_v25 = vld [vmem:[%s660_s0 + $0x48] sm:$0xff] }
   0x8   :  { %206 = vperm.xlu1 %447, %v192_v13   ;;  %v258_v26 = vld [vmem:[%s664_s4] sm:$0xff]  ;;  %v259_v27 = vld [vmem:[%s664_s4 + $0x8] sm:$0xff]  ;;  %v405_v28 = vpack.c.bf16 %v33_v25, %v32_v24  ;;  %v260_v29 = vld [vmem:[%s664_s4 + $0x10] sm:$0xff] }
   0x9   :  { %v261_v30 = vld [vmem:[%s664_s4 + $0x18] sm:$0xff]  ;;  %v34_v31 = vld [vmem:[%s660_s0 + $0x50] sm:$0xff]  ;;  %v36_v34 = vld [vmem:[%s660_s0 + $0x60] sm:$0xff] }
   0xa   :  { %v35_v32 = vld [vmem:[%s660_s0 + $0x58] sm:$0xff]  ;;  %v37_v35 = vld [vmem:[%s660_s0 + $0x68] sm:$0xff]  ;;  %v38_v37 = vld [vmem:[%s660_s0 + $0x70] sm:$0xff] }
   0xb   :  { %201 = vperm.xlu0 %446, %v191_v15   ;;  %v411_v33 = vpack.c.bf16 %v35_v32, %v34_v31  ;;  %v417_v36 = vpack.c.bf16 %v37_v35, %v36_v34  ;;  %v39_v38 = vld [vmem:[%s660_s0 + $0x78] sm:$0xff]  ;;  %v41_v40 = vld [vmem:[%s661_s1 + $0x8] sm:$0xff] }
   0xc   :  { %224 = vperm.xlu1 %447, %v218_v16   ;;  %v423_v39 = vpack.c.bf16 %v39_v38, %v38_v37  ;;  %v43_v41 = vld [vmem:[%s661_s1 + $0x18] sm:$0xff] }
   0xd   :  { %392 = vmatpush3.bf16.xpose.msk.msra.mxu0 %vm492_vm1, %v387_v7  ;;  %438 = vmatpush3.bf16.xpose.msk.msra.mxu1 %vm492_vm1, %v387_v7 }
   0xe   :  { %395 = vmatprep.subr.msk.bf16.mxu0 %vm492_vm1, %v393_v14  ;;  %431 = vmatprep.subr.msk.bf16.mxu1 %vm492_vm1, %v393_v14 }
   0xf   :  { %229 = vperm.xlu0 %446, %v219_v19  }
  0x10   :  { %211 = vperm.xlu1 %447, %v193_v20  }
  0x13   :  { %234 = vperm.xlu0 %446, %v220_v22   ;;  %v296_v22 = vstv %s665_s5 }
  0x14   :  { %239 = vperm.xlu1 %447, %v221_v23  }
  0x15   :  { %398 = vmatpush3.bf16.xpose.msk.msra.mxu0 %vm492_vm1, %v393_v14  ;;  %439 = vmatpush3.bf16.xpose.msk.msra.mxu1 %vm492_vm1, %v393_v14 }
  0x16   :  { %401 = vmatprep.subr.msk.bf16.mxu0 %vm492_vm1, %v399_v21  ;;  %432 = vmatprep.subr.msk.bf16.mxu1 %vm492_vm1, %v399_v21 }
  0x17   :  { %264 = vperm.xlu0 %446, %v258_v26  }
  0x18   :  { %269 = vperm.xlu1 %447, %v259_v27  }
  0x1b   :  { %274 = vperm.xlu0 %446, %v260_v29  }
  0x1c   :  { %279 = vperm.xlu1 %447, %v261_v30  }
  0x1d   :  { %404 = vmatpush3.bf16.xpose.msk.msra.mxu0 %vm492_vm1, %v399_v21  ;;  %440 = vmatpush3.bf16.xpose.msk.msra.mxu1 %vm492_vm1, %v399_v21 }
  0x1e   :  { %407 = vmatprep.subr.msk.bf16.mxu0 %vm492_vm1, %v405_v28  ;;  %433 = vmatprep.subr.msk.bf16.mxu1 %vm492_vm1, %v405_v28 }
  0x25   :  { %410 = vmatpush3.bf16.xpose.msk.msra.mxu0 %vm492_vm1, %v405_v28  ;;  %441 = vmatpush3.bf16.xpose.msk.msra.mxu1 %vm492_vm1, %v405_v28 }
  0x26   :  { %413 = vmatprep.subr.msk.bf16.mxu0 %vm492_vm1, %v411_v33  ;;  %434 = vmatprep.subr.msk.bf16.mxu1 %vm492_vm1, %v411_v33 }
  0x2d   :  { %416 = vmatpush3.bf16.xpose.msk.msra.mxu0 %vm492_vm1, %v411_v33  ;;  %442 = vmatpush3.bf16.xpose.msk.msra.mxu1 %vm492_vm1, %v411_v33 }
  0x2e   :  { %419 = vmatprep.subr.msk.bf16.mxu0 %vm492_vm1, %v417_v36  ;;  %435 = vmatprep.subr.msk.bf16.mxu1 %vm492_vm1, %v417_v36 }
  0x35   :  { %422 = vmatpush3.bf16.xpose.msk.msra.mxu0 %vm492_vm1, %v417_v36  ;;  %443 = vmatpush3.bf16.xpose.msk.msra.mxu1 %vm492_vm1, %v417_v36 }
  0x36   :  { %425 = vmatprep.subr.msk.bf16.mxu0 %vm492_vm1, %v423_v39  ;;  %436 = vmatprep.subr.msk.bf16.mxu1 %vm492_vm1, %v423_v39 }
  0x3d   :  { %428 = vmatpush3.bf16.xpose.msk.msra.mxu0 %vm492_vm1, %v423_v39  ;;  %444 = vmatpush3.bf16.xpose.msk.msra.mxu1 %vm492_vm1, %v423_v39 }
  0x44   :  { %376 = vmatmul.mubr.msk.f32.vlgmr.msra.gmra.mrb[0].mxu0 %vm44_vm0, %v41_v40  ;;  %379 = vmatmul.mubr.msk.f32.vlgmr.msra.gmra.mrb[0].mxu1 %vm44_vm0, %v43_v41 }
  0x86   :  { %v197_v42 = vpop.permute.xlu0 %196 }
  0x87   :  { %v207_v43 = vpop.permute.xlu1 %206 }
  0x8a   :  { %v202_v44 = vpop.permute.xlu0 %201 }
  0x8b   :  { %v225_v45 = vpop.permute.xlu1 %224 }
  0x8e   :  { %v230_v46 = vpop.permute.xlu0 %229 }
  0x8f   :  { %v212_v47 = vpop.permute.xlu1 %211 }
  0x92   :  { %v235_v48 = vpop.permute.xlu0 %234 }
  0x93   :  { %v240_v49 = vpop.permute.xlu1 %239 }
  0x96   :  { %v265_v60 = vpop.permute.xlu0 %264 }
  0x97   :  { %v270_v1 = vpop.permute.xlu1 %269 }
  0x9a   :  { %v275_v9 = vpop.permute.xlu0 %274 }
  0x9b   :  { %v280_v13 = vpop.permute.xlu1 %279 }
 0x117   :  { %v377_v50 = vpop.f32.mrb[0].mxu0  ;;  %v380_v51 = vpop.f32.mrb[0].mxu1 }
 0x118   :  { %v215_v52 = vmul.f32 %v377_v50, %v202_v44  ;;  %v217_v53 = vmul.f32 %v380_v51, %v212_v47  ;;  %v171_v54 = vpop.f32.mrb[1].mxu0  ;;  %v181_v55 = vpop.f32.mrb[1].mxu1 }
 0x119   :  { %v214_v56 = vmul.f32 %v197_v42, %v171_v54  ;;  %v216_v57 = vmul.f32 %v207_v43, %v181_v55 }
 0x11a   :  { %v243_v58 = vadd.f32 %v230_v46, %v215_v52  ;;  %v245_v59 = vadd.f32 %v240_v49, %v217_v53 }
 0x11b   :  { %v242_v61 = vadd.f32 %v225_v45, %v214_v56  ;;  %v244_v62 = vadd.f32 %v235_v48, %v216_v57 }
 0x11c   :  { %vm247_vm2 = vcmp.ge.f32.partialorder %v243_v58, 0.0  ;;  %v251_v63 = vmul.f32 0.01, %v243_v58  ;;  %v253_v0 = vmul.f32 0.01, %v245_v59  ;;  %vm249_vm5 = vcmp.ge.f32.partialorder %v245_v59, 0.0 }
 0x11d   :  { %vm246_vm3 = vcmp.ge.f32.partialorder %v242_v61, 0.0  ;;  %v250_v2 = vmul.f32 0.01, %v242_v61  ;;  %vm248_vm4 = vcmp.ge.f32.partialorder %v244_v62, 0.0  ;;  %v252_v3 = vmul.f32 0.01, %v244_v62 }
 0x11e   :  { %v255_v4 = vsel %vm247_vm2, %v243_v58, %v251_v63  ;;  %v257_v10 = vsel %vm249_vm5, %v245_v59, %v253_v0 }
 0x11f   :  { %v283_v5 = vmul.f32 %v270_v1, %v255_v4  ;;  %v254_v6 = vsel %vm246_vm3, %v242_v61, %v250_v2  ;;  %v256_v7 = vsel %vm248_vm4, %v244_v62, %v252_v3  ;;  %v285_v14 = vmul.f32 %v280_v13, %v257_v10 }
 0x120   :  { %v282_v8 = vmul.f32 %v265_v60, %v254_v6  ;;  %v284_v12 = vmul.f32 %v275_v9, %v256_v7 }
 0x122   :  { %v286_v11 = vadd.f32 %v283_v5, %v282_v8 }
 0x124   :  { %v287_v15 = vadd.f32 %v286_v11, %v284_v12 }
 0x126   :  { %v288_v16 = vadd.f32 %v287_v15, %v285_v14 }
 0x128   :  { %v289_v17 = vrot.slane %v288_v16, 4 }
 0x12a   :  { %v290_v18 = vadd.f32 %v289_v17, %v288_v16 }
 0x12c   :  { %v291_v19 = vrot.slane %v290_v18, 2 }
 0x12e   :  { %v292_v20 = vadd.f32 %v291_v19, %v290_v18 }
 0x130   :  { %v293_v21 = vrot.slane %v292_v20, 1 }
 0x132   :  { %v294_v23 = vadd.f32 %v293_v21, %v292_v20 }
 0x134   :  { %v297_v24 = vadd.f32 %v296_v22, %v294_v23 }
 0x136   :  { %298 = vst [vmem:[%s666_s6] sm:$0x1] %v297_v24 }

</bundles_post_ra>
